<compile_context>
chip_gen: v7x
topology: tpu7x:2x2x1
jax: 0.10.0
libtpu: 0.0.40
codegen_flags: <defaults>
</compile_context>

<pallas_src>
import functools
import math

import jax
import jax.numpy as jnp
from jax import lax
from jax.experimental import pallas as pl
from jax.experimental.pallas import tpu as pltpu

DROPOUT_P = 0.1


def make_positional_encoding(max_len: int, d_model: int) -> jnp.ndarray:
    """Deterministic sinusoidal PE buffer, shape (max_len, 1, d_model)."""
    position = jnp.arange(max_len, dtype=jnp.float32)[:, None]            # (L, 1)
    div_term = jnp.exp(
        jnp.arange(0, d_model, 2, dtype=jnp.float32) * (-math.log(10000.0) / d_model)
    )                                                                      # (D/2,)
    pe = jnp.zeros((max_len, d_model), dtype=jnp.float32)
    pe = pe.at[:, 0::2].set(jnp.sin(position * div_term))
    pe = pe.at[:, 1::2].set(jnp.cos(position * div_term))
    # torch: pe.unsqueeze(0).transpose(0, 1) -> (max_len, 1, d_model)
    return pe[:, None, :]


def _hash_u32(v):
    """lowbias32 integer mixer (elementwise, uint32)."""
    v = (v ^ (v >> 16)) * jnp.uint32(0x7FEB352D)
    v = (v ^ (v >> 15)) * jnp.uint32(0x846CA68B)
    return v ^ (v >> 16)


def _pe_dropout_kernel(seed_ref, x_ref, pe_ref, o_ref, *, dropout_p, apply_dropout):
    x = x_ref[...]          # (ts, B, D)
    pe = pe_ref[...]        # (ts, 1, D) -> sublane broadcast over batch
    y = x + pe

    if not apply_dropout:
        o_ref[...] = y.astype(o_ref.dtype)
        return

    ts, B, D = x_ref.shape
    tile = pl.program_id(0)
    seed_u = seed_ref[0].astype(jnp.uint32)

    # Global element index -> stateless Bernoulli mask, decorrelated per tile.
    s = lax.broadcasted_iota(jnp.int32, (ts, B, D), 0)
    b = lax.broadcasted_iota(jnp.int32, (ts, B, D), 1)
    d = lax.broadcasted_iota(jnp.int32, (ts, B, D), 2)
    flat = ((tile * ts + s) * B + b) * D + d
    mix = flat.astype(jnp.uint32) ^ (
        seed_u * jnp.uint32(0x9E3779B9) + jnp.uint32(0x85EBCA6B)
    )
    bits = _hash_u32(mix)

    # Inverted dropout via integer threshold: drop iff bits < p * 2^32.
    threshold = jnp.uint32(int(round(dropout_p * (2.0 ** 32))))
    keep = bits >= threshold
    scale = jnp.float32(1.0 / (1.0 - dropout_p))
    o_ref[...] = jnp.where(keep, y * scale, jnp.zeros_like(y)).astype(o_ref.dtype)


def _choose_seq_tile(S, B, D, itemsize, vmem_budget_bytes=16 * 1024 * 1024):
    """Sequence-tile size: biggest multiple-of-8 row count fitting the budget.

    Per sequence row (double-buffered): x-in (B*D) + out (B*D) + pe-in
    (the (ts,1,D) block pads its sublane dim to 8 in VMEM -> 8*D).
    16 MiB budget leaves headroom under the 32 MiB default scoped VMEM on
    all of v5e / v6e / v7x.
    """
    bytes_per_row = itemsize * D * (2 * B + 2 * B + 2 * 8)
    rows = max(8, (vmem_budget_bytes // max(1, bytes_per_row)) // 8 * 8)
    return min(rows, S)


def positional_encoding_forward(x, pe, *, seed=0, dropout_p=DROPOUT_P, training=True):
    """x: (seq_len, batch, d_model); pe: (max_len, 1, d_model)."""
    S, B, D = x.shape
    pe_slice = pe[:S]                               # (S, 1, D), same as pe[:x.size(0), :]
    seed_arr = jnp.asarray([seed], dtype=jnp.int32)

    ts = _choose_seq_tile(S, B, D, x.dtype.itemsize)
    grid = (pl.cdiv(S, ts),)
    apply_dropout = bool(training) and float(dropout_p) > 0.0

    kernel = functools.partial(
        _pe_dropout_kernel,
        dropout_p=float(dropout_p),
        apply_dropout=apply_dropout,
    )

    itemsize = x.dtype.itemsize
    cost = pl.CostEstimate(
        flops=2 * S * B * D,
        transcendentals=0,
        bytes_accessed=2 * S * B * D * itemsize + S * D * pe.dtype.itemsize,
    )

    return pl.pallas_call(
        kernel,
        out_shape=jax.ShapeDtypeStruct(x.shape, x.dtype),
        grid=grid,
        in_specs=[
            pl.BlockSpec(memory_space=pltpu.MemorySpace.SMEM),     # seed scalar
            pl.BlockSpec((ts, B, D), lambda i: (i, 0, 0)),         # x tile
            pl.BlockSpec((ts, 1, D), lambda i: (i, 0, 0)),         # pe tile
        ],
        out_specs=pl.BlockSpec((ts, B, D), lambda i: (i, 0, 0)),
        compiler_params=pltpu.CompilerParams(
            dimension_semantics=("parallel",),
        ),
        cost_estimate=cost,
    )(seed_arr, x, pe_slice)


if __name__ == "__main__":
    # Small shapes consistent with the module's forward:
    # x: (seq_len=8, batch=2, d_model=32)
    seq_len, batch, d_model = 8, 2, 32
    max_len = 64   # small stand-in for max_len=5000 (only first seq_len rows used)

    key = jax.random.PRNGKey(0)
    x = jax.random.normal(key, (seq_len, batch, d_model), dtype=jnp.float32)
    pe = make_positional_encoding(max_len, d_model)

    out_train = positional_encoding_forward(x, pe, seed=0, training=True)
    out_eval = positional_encoding_forward(x, pe, training=False)
    jax.block_until_ready((out_train, out_eval))

    assert out_train.shape == x.shape and out_train.dtype == x.dtype

    # Eval path (no dropout) must exactly match x + pe broadcast.
    ref = x + pe[:seq_len]
    assert jnp.allclose(out_eval, ref, atol=1e-6)

    # Train path: every kept element equals ref / (1 - p); dropped are 0.
    kept = out_train != 0.0
    assert jnp.allclose(
        jnp.where(kept, out_train, 0.0),
        jnp.where(kept, ref / (1.0 - DROPOUT_P), 0.0),
        atol=1e-5,
    )

    print("KERNEL_OK")
</pallas_src>

<mosaic_0001>
module attributes {stable_mosaic.version = 11 : i64} {
  func.func @_pe_dropout_kernel(%arg0: i32, %arg1: memref<1xi32, #tpu.memory_space<smem>>, %arg2: memref<8x2x32xf32, #tpu.memory_space<vmem>>, %arg3: memref<8x1x32xf32, #tpu.memory_space<vmem>>, %arg4: memref<8x2x32xf32, #tpu.memory_space<vmem>>) attributes {dimension_semantics = [#tpu.dimension_semantics<parallel>], iteration_bounds = array<i64: 1>, scalar_prefetch = 0 : i64, scratch_operands = 0 : i64, tpu.core_type = #tpu.core_type<tc>, window_params = [{transform_indices = @transform_0, window_bounds = array<i64: 1>}, {transform_indices = @transform_1, window_bounds = array<i64: 8, 2, 32>}, {transform_indices = @transform_2, window_bounds = array<i64: 8, 1, 32>}, {transform_indices = @transform_3, window_bounds = array<i64: 8, 2, 32>}]} {
    %c0 = arith.constant 0 : index
    %c0_0 = arith.constant 0 : index
    %c0_1 = arith.constant 0 : index
    %0 = vector.load %arg2[%c0, %c0_0, %c0_1] : memref<8x2x32xf32, #tpu.memory_space<vmem>>, vector<8x2x32xf32>
    %c0_2 = arith.constant 0 : index
    %c0_3 = arith.constant 0 : index
    %c0_4 = arith.constant 0 : index
    %1 = vector.load %arg3[%c0_2, %c0_3, %c0_4] : memref<8x1x32xf32, #tpu.memory_space<vmem>>, vector<8x1x32xf32>
    %2 = vector.broadcast %1 : vector<8x1x32xf32> to vector<8x2x32xf32>
    %3 = arith.addf %0, %2 : vector<8x2x32xf32>
    %c0_5 = arith.constant 0 : index
    %4 = memref.load %arg1[%c0_5] : memref<1xi32, #tpu.memory_space<smem>>
    %5 = tpu.iota {dimensions = array<i32: 0>} : vector<8x2x32xi32>
    %6 = tpu.iota {dimensions = array<i32: 1>} : vector<8x2x32xi32>
    %7 = tpu.iota {dimensions = array<i32: 2>} : vector<8x2x32xi32>
    %c8_i32 = arith.constant 8 : i32
    %8 = arith.muli %arg0, %c8_i32 : i32
    %9 = vector.broadcast %8 : i32 to vector<8x2x32xi32>
    %10 = arith.addi %9, %5 : vector<8x2x32xi32>
    %c2_i32 = arith.constant 2 : i32
    %11 = vector.broadcast %c2_i32 : i32 to vector<8x2x32xi32>
    %12 = arith.muli %10, %11 : vector<8x2x32xi32>
    %13 = arith.addi %12, %6 : vector<8x2x32xi32>
    %c32_i32 = arith.constant 32 : i32
    %14 = vector.broadcast %c32_i32 : i32 to vector<8x2x32xi32>
    %15 = arith.muli %13, %14 : vector<8x2x32xi32>
    %16 = arith.addi %15, %7 : vector<8x2x32xi32>
    %c-1640531527_i32 = arith.constant -1640531527 : i32
    %17 = arith.muli %4, %c-1640531527_i32 : i32
    %c-2048144789_i32 = arith.constant -2048144789 : i32
    %18 = arith.addi %17, %c-2048144789_i32 : i32
    %19 = vector.broadcast %18 : i32 to vector<8x2x32xi32>
    %20 = arith.xori %16, %19 : vector<8x2x32xi32>
    %c16_i32 = arith.constant 16 : i32
    %21 = vector.broadcast %c16_i32 : i32 to vector<8x2x32xi32>
    %22 = arith.shrui %20, %21 : vector<8x2x32xi32>
    %23 = arith.xori %20, %22 : vector<8x2x32xi32>
    %c2146121005_i32 = arith.constant 2146121005 : i32
    %24 = vector.broadcast %c2146121005_i32 : i32 to vector<8x2x32xi32>
    %25 = arith.muli %23, %24 : vector<8x2x32xi32>
    %c15_i32 = arith.constant 15 : i32
    %26 = vector.broadcast %c15_i32 : i32 to vector<8x2x32xi32>
    %27 = arith.shrui %25, %26 : vector<8x2x32xi32>
    %28 = arith.xori %25, %27 : vector<8x2x32xi32>
    %c-2073254261_i32 = arith.constant -2073254261 : i32
    %29 = vector.broadcast %c-2073254261_i32 : i32 to vector<8x2x32xi32>
    %30 = arith.muli %28, %29 : vector<8x2x32xi32>
    %c16_i32_6 = arith.constant 16 : i32
    %31 = vector.broadcast %c16_i32_6 : i32 to vector<8x2x32xi32>
    %32 = arith.shrui %30, %31 : vector<8x2x32xi32>
    %33 = arith.xori %30, %32 : vector<8x2x32xi32>
    %c429496730_i32 = arith.constant 429496730 : i32
    %34 = vector.broadcast %c429496730_i32 : i32 to vector<8x2x32xi32>
    %35 = arith.cmpi uge, %33, %34 : vector<8x2x32xi32>
    %cst = arith.constant 1.11111116 : f32
    %36 = vector.broadcast %cst : f32 to vector<8x2x32xf32>
    %37 = arith.mulf %3, %36 : vector<8x2x32xf32>
    %cst_7 = arith.constant 0.000000e+00 : f32
    %38 = vector.broadcast %cst_7 : f32 to vector<8x2x32xf32>
    %39 = arith.select %35, %37, %38 : vector<8x2x32xi1>, vector<8x2x32xf32>
    %c0_8 = arith.constant 0 : index
    %c0_9 = arith.constant 0 : index
    %c0_10 = arith.constant 0 : index
    %40 = vector.load %arg4[%c0_8, %c0_9, %c0_10] : memref<8x2x32xf32, #tpu.memory_space<vmem>>, vector<8x2x32xf32>
    tpu.vector_store %arg4[%c0_8, %c0_9, %c0_10], %39 {strides = array<i32>} : memref<8x2x32xf32, #tpu.memory_space<vmem>>, vector<8x2x32xf32>,
    return
  }
  func.func @transform_0(%arg0: i32) -> i32 {
    %c0_i32 = arith.constant 0 : i32
    %c0_i32_0 = arith.constant 0 : i32
    return %c0_i32 : i32
  }
  func.func @transform_1(%arg0: i32) -> (i32, i32, i32) {
    %c0_i32 = arith.constant 0 : i32
    %c0_i32_0 = arith.constant 0 : i32
    %c0_i32_1 = arith.constant 0 : i32
    return %arg0, %c0_i32, %c0_i32_0 : i32, i32, i32
  }
  func.func @transform_2(%arg0: i32) -> (i32, i32, i32) {
    %c0_i32 = arith.constant 0 : i32
    %c0_i32_0 = arith.constant 0 : i32
    %c0_i32_1 = arith.constant 0 : i32
    return %arg0, %c0_i32, %c0_i32_0 : i32, i32, i32
  }
  func.func @transform_3(%arg0: i32) -> (i32, i32, i32) {
    %c0_i32 = arith.constant 0 : i32
    %c0_i32_0 = arith.constant 0 : i32
    %c0_i32_1 = arith.constant 0 : i32
    return %arg0, %c0_i32, %c0_i32_0 : i32, i32, i32
  }
}

</mosaic_0001>

<bundles_post_ra>
// kernel: tpu_custom_call.1
= control target key start
LH: loop header
LB: loop body
LE: loop exit
PB: predicated region body
PF: predicated region fallthrough
CT: control target
= control target key end

     0   :  { %9 = vsyncpa [#allocation4], 0  ;;  %s475_s0 = inlined_call_operand.<no memory space> [shape: s32[1], index: 0, kind: input, shape index: {}]   ;;  %s476_s1 = inlined_call_operand.hbm [shape: f32[8,2,32], index: 1, kind: input, shape index: {}]   ;;  %s477_s2 = inlined_call_operand.hbm [shape: f32[8,1,32], index: 2, kind: input, shape index: {}]   ;;  %s478_s3 = inlined_call_operand.hbm [shape: f32[8,2,32], index: 3, kind: output, shape index: {}]  }
   0x1   :  { %10 = vsyncpa [#allocation7], 0 }
   0x2   :  { %11 = vsyncpa [#allocation5], 0  ;;  %s375_s12 = smov [#allocation3]   ;;  %s303_s16 = scalar_lea.hbm %s476_s1, 256 }
   0x3   :  { %s19_s13 = sshll.u32 %s375_s12, 4  ;;  %p304_p0 = scmp.ne.s32.totalorder %s476_s1, %s303_s16  ;;  %s20_s13 = int_to_ptr.vmem [resolvable:$true] %s19_s13 }
   0x4   :  { %p307_p1 = scmp.lt.u32.totalorder %s303_s16, %s476_s1 }
   0x6   :  { %p309_p2 = pnand %p307_p1, %p304_p0 }
   0x8   :  { %312 = shalt.err (!%p309_p2)
}
   0x9   :  { %s313_s21 = scalar_lea.vmem %s20_s13, 256  ;;  %p318_p4 = scmp.lt.s32.totalorder %s20_s13, %s20_s13 }
   0xa   :  { %p314_p3 = scmp.ne.s32.totalorder %s20_s13, %s313_s21  ;;  %p319_p5 = scmp.lt.s32.totalorder %s313_s21, %s313_s21 }
   0xc   :  { %p320_p6 = por %p319_p5, %p318_p4 }
   0xe   :  { %p321_p7 = pnand %p320_p6, %p314_p3 }
  0x10   :  { %324 = shalt.err (!%p321_p7)
}
  0x11   :  { %s376_s22 = smov 32   ;;  %s377_s23 = smov 2  }
  0x12   :  { %25 = dma.hbm_to_vmem [thread:$0]  %s476_s1, 256, %s20_s13, [#allocation4], %s376_s22, %s376_s22, %s377_s23  }
  0x13   :  { %s378_s26 = smov [#allocation6]   ;;  %s325_s30 = scalar_lea.hbm %s477_s2, 128 }
  0x14   :  { %s31_s27 = sshll.u32 %s378_s26, 4  ;;  %p326_p8 = scmp.ne.s32.totalorder %s477_s2, %s325_s30  ;;  %s32_s27 = int_to_ptr.vmem [resolvable:$true] %s31_s27 }
  0x15   :  { %p329_p9 = scmp.lt.u32.totalorder %s325_s30, %s477_s2 }
  0x17   :  { %p331_p10 = pnand %p329_p9, %p326_p8 }
  0x19   :  { %334 = shalt.err (!%p331_p10)
}
  0x1a   :  { %s335_s8 = scalar_lea.vmem %s32_s27, 128  ;;  %p340_p12 = scmp.lt.s32.totalorder %s32_s27, %s32_s27 }
  0x1b   :  { %p336_p11 = scmp.ne.s32.totalorder %s32_s27, %s335_s8  ;;  %p341_p13 = scmp.lt.s32.totalorder %s335_s8, %s335_s8 }
  0x1d   :  { %p342_p0 = por %p341_p13, %p340_p12 }
  0x1f   :  { %p343_p1 = pnand %p342_p0, %p336_p11 }
  0x21   :  { %346 = shalt.err (!%p343_p1)
}
  0x22   :  { %s379_s1 = smov 16   ;;  %s380_s9 = smov 1  }
  0x23   :  { %37 = dma.hbm_to_vmem [thread:$0]  %s477_s2, 128, %s32_s27, [#allocation7], %s379_s1, %s379_s1, %s380_s9  }
  0x24   :  { %369 = dma.done.wait [#allocation4], 256  }
  0x25   :  { %370 = vsyncadd [#allocation4], 4294967040 }
  0x26   :  { %371 = dma.done.wait [#allocation7], 128  }
  0x27   :  { %372 = vsyncadd [#allocation7], 4294967168  ;;  %v117_v0 = vlaneseq  ;;  %s162_s14 = smul.u32 2654435769, %s475_s0  ;;  %v44_v12 = vld [vmem:[#allocation3] sm:$0x3] }
  0x28   :  { %v288_v13 = vld [vmem:[#allocation6] ss:$0 sm:$0xff]  ;;  %v45_v15 = vld [vmem:[#allocation3 + $0x2] sm:$0x3]  ;;  %v289_v16 = vld [vmem:[#allocation6 + $0x1] ss:$0 sm:$0xff] }
  0x29   :  { %v118_v1 = vshrl.u32 %v117_v0, 7  ;;  %v432_v2 = vand.u32 127, %v117_v0  ;;  %s163_s15 = sadd.s32 2246822507, %s162_s14  ;;  %v108_v21 = vadd.f32 %v288_v13, %v44_v12  ;;  %v46_v24 = vld [vmem:[#allocation3 + $0x4] sm:$0x3]  ;;  %v109_v27 = vadd.f32 %v289_v16, %v45_v15 }
  0x2a   :  { %v434_v6 = vstv %s163_s15  ;;  %v290_v25 = vld [vmem:[#allocation6 + $0x2] ss:$0 sm:$0xff]  ;;  %v47_v35 = vld [vmem:[#allocation3 + $0x6] sm:$0x3]  ;;  %v291_v36 = vld [vmem:[#allocation6 + $0x3] ss:$0 sm:$0xff] }
  0x2b   :  { %v146_v3 = vmul.u32 32, %v118_v1  ;;  %v139_v4 = vadd.s32 2, %v118_v1  ;;  %v140_v5 = vadd.s32 4, %v118_v1  ;;  %v141_v7 = vadd.s32 6, %v118_v1  ;;  %v48_v61 = vld [vmem:[#allocation3 + $0x8] sm:$0x3] }
  0x2c   :  { %v142_v8 = vadd.s32 8, %v118_v1  ;;  %v143_v29 = vadd.s32 10, %v118_v1  ;;  %v144_v33 = vadd.s32 12, %v118_v1  ;;  %v110_v34 = vadd.f32 %v290_v25, %v46_v24  ;;  %v292_v62 = vld [vmem:[#allocation6 + $0x4] ss:$0 sm:$0xff]  ;;  %s381_s0 = smov [#allocation8]  }
  0x2d   :  { %v154_v9 = vadd.s32 %v146_v3, %v432_v2  ;;  %v147_v10 = vmul.u32 32, %v139_v4  ;;  %v148_v11 = vmul.u32 32, %v140_v5  ;;  %v145_v39 = vadd.s32 14, %v118_v1  ;;  %s275_s2 = sshll.u32 %s381_s0, 4  ;;  %s276_s2 = int_to_ptr.vmem [resolvable:$true] %s275_s2 }
  0x2e   :  { %v149_v19 = vmul.u32 32, %v141_v7  ;;  %v150_v20 = vmul.u32 32, %v142_v8  ;;  %v245_v41 = vmul.f32 1.1111112, %v108_v21  ;;  %v246_v44 = vmul.f32 1.1111112, %v109_v27  ;;  %p352_p3 = scmp.lt.s32.totalorder %s276_s2, %s276_s2 }
  0x2f   :  { %v165_v14 = vxor.u32 %v434_v6, %v154_v9  ;;  %v155_v17 = vadd.s32 %v147_v10, %v432_v2  ;;  %v156_v18 = vadd.s32 %v148_v11, %v432_v2  ;;  %v151_v47 = vmul.u32 32, %v143_v29  ;;  %s347_s16 = scalar_lea.vmem %s276_s2, 256 }
  0x30   :  { %v157_v28 = vadd.s32 %v149_v19, %v432_v2  ;;  %v158_v38 = vadd.s32 %v150_v20, %v432_v2  ;;  %v111_v51 = vadd.f32 %v291_v36, %v47_v35  ;;  %vm261_vm0 = vcmask 254976   ;;  %p348_p2 = scmp.ne.s32.totalorder %s276_s2, %s347_s16  ;;  %p353_p4 = scmp.lt.s32.totalorder %s347_s16, %s347_s16 }
  0x31   :  { %v173_v22 = vshrl.u32 %v165_v14, 16  ;;  %v166_v23 = vxor.u32 %v434_v6, %v155_v17  ;;  %v167_v26 = vxor.u32 %v434_v6, %v156_v18  ;;  %v159_v54 = vadd.s32 %v151_v47, %v432_v2 }
  0x32   :  { %v168_v37 = vxor.u32 %v434_v6, %v157_v28  ;;  %v169_v46 = vxor.u32 %v434_v6, %v158_v38  ;;  %v152_v55 = vmul.u32 32, %v144_v33  ;;  %v247_v59 = vmul.f32 1.1111112, %v110_v34  ;;  %p354_p5 = por %p353_p4, %p352_p3 }
  0x33   :  { %v181_v30 = vxor.u32 %v173_v22, %v165_v14  ;;  %v174_v31 = vshrl.u32 %v166_v23, 16  ;;  %v175_v32 = vshrl.u32 %v167_v26, 16  ;;  %v170_v0 = vxor.u32 %v434_v6, %v159_v54 }
  0x34   :  { %v176_v45 = vshrl.u32 %v168_v37, 16  ;;  %v177_v53 = vshrl.u32 %v169_v46, 16  ;;  %v160_v1 = vadd.s32 %v152_v55, %v432_v2  ;;  %v248_v7 = vmul.f32 1.1111112, %v111_v51  ;;  %p355_p6 = pnand %p354_p5, %p348_p2 }
  0x35   :  { %v189_v40 = vmul.u32 2146121005, %v181_v30  ;;  %v182_v42 = vxor.u32 %v174_v31, %v166_v23  ;;  %v183_v43 = vxor.u32 %v175_v32, %v167_v26  ;;  %v178_v10 = vshrl.u32 %v170_v0, 16  ;;  %v49_v30 = vld [vmem:[#allocation3 + $0xa] sm:$0x3] }
  0x36   :  { %v184_v52 = vxor.u32 %v176_v45, %v168_v37  ;;  %v185_v63 = vxor.u32 %v177_v53, %v169_v46  ;;  %v171_v11 = vxor.u32 %v434_v6, %v160_v1  ;;  %v112_v15 = vadd.f32 %v292_v62, %v48_v61  ;;  %v293_v31 = vld [vmem:[#allocation6 + $0x5] ss:$0 sm:$0xff]  ;;  %v50_v45 = vld [vmem:[#allocation3 + $0xc] sm:$0x3]  ;;  %v294_v46 = vld [vmem:[#allocation6 + $0x6] ss:$0 sm:$0xff] }
  0x37   :  { %v197_v48 = vshrl.u32 %v189_v40, 15  ;;  %v190_v49 = vmul.u32 2146121005, %v182_v42  ;;  %v191_v50 = vmul.u32 2146121005, %v183_v43  ;;  %v186_v18 = vxor.u32 %v178_v10, %v170_v0 }
  0x38   :  { %v192_v60 = vmul.u32 2146121005, %v184_v52  ;;  %v193_v9 = vmul.u32 2146121005, %v185_v63  ;;  %v179_v19 = vshrl.u32 %v171_v11, 16  ;;  %v114_v53 = vadd.f32 %v294_v46, %v50_v45 }
  0x39   :  { %v205_v56 = vxor.u32 %v197_v48, %v189_v40  ;;  %v198_v57 = vshrl.u32 %v190_v49, 15  ;;  %v199_v58 = vshrl.u32 %v191_v50, 15  ;;  %v153_v23 = vmul.u32 32, %v145_v39  ;;  %v51_v61 = vld [vmem:[#allocation3 + $0xe] sm:$0x3] }
  0x3a   :  { %v200_v8 = vshrl.u32 %v192_v60, 15  ;;  %v201_v17 = vshrl.u32 %v193_v9, 15  ;;  %v194_v26 = vmul.u32 2146121005, %v186_v18  ;;  %v187_v27 = vxor.u32 %v179_v19, %v171_v11  ;;  %v295_v62 = vld [vmem:[#allocation6 + $0x7] ss:$0 sm:$0xff] }
  0x3b   :  { %v213_v3 = vmul.u32 2221713035, %v205_v56  ;;  %v206_v4 = vxor.u32 %v198_v57, %v190_v49  ;;  %v207_v5 = vxor.u32 %v199_v58, %v191_v50  ;;  %v161_v32 = vadd.s32 %v153_v23, %v432_v2 }
  0x3c   :  { %v208_v16 = vxor.u32 %v200_v8, %v192_v60  ;;  %v209_v25 = vxor.u32 %v201_v17, %v193_v9  ;;  %v202_v36 = vshrl.u32 %v194_v26, 15  ;;  %v195_v37 = vmul.u32 2146121005, %v187_v27 }
  0x3d   :  { %v221_v12 = vshrl.u32 %v213_v3, 16  ;;  %v214_v13 = vmul.u32 2221713035, %v206_v4  ;;  %v215_v14 = vmul.u32 2221713035, %v207_v5  ;;  %v172_v38 = vxor.u32 %v434_v6, %v161_v32 }
  0x3e   :  { %v216_v24 = vmul.u32 2221713035, %v208_v16  ;;  %v217_v35 = vmul.u32 2221713035, %v209_v25  ;;  %v249_v2 = vmul.f32 1.1111112, %v112_v15  ;;  %v113_v50 = vadd.f32 %v293_v31, %v49_v30 }
  0x3f   :  { %v229_v20 = vxor.u32 %v221_v12, %v213_v3  ;;  %v222_v21 = vshrl.u32 %v214_v13, 16  ;;  %v223_v22 = vshrl.u32 %v215_v14, 16  ;;  %v203_v47 = vshrl.u32 %v195_v37, 15 }
  0x40   :  { %v224_v34 = vshrl.u32 %v216_v24, 16  ;;  %v225_v43 = vshrl.u32 %v217_v35, 16  ;;  %v180_v48 = vshrl.u32 %v172_v38, 16  ;;  %v250_v58 = vmul.f32 1.1111112, %v113_v50 }
  0x41   :  { %vm237_vm1 = vcmp.ge.u32.totalorder %v229_v20, 429496730  ;;  %v230_v28 = vxor.u32 %v222_v21, %v214_v13  ;;  %v231_v29 = vxor.u32 %v223_v22, %v215_v14  ;;  %v211_v6 = vxor.u32 %v203_v47, %v195_v37 }
  0x42   :  { %v253_v33 = vsel %vm237_vm1, %v245_v41, 0.0  ;;  %v232_v42 = vxor.u32 %v224_v34, %v216_v24  ;;  %v210_v41 = vxor.u32 %v202_v36, %v194_v26  ;;  %v233_v49 = vxor.u32 %v225_v43, %v217_v35 }
  0x43   :  { %262 = vst.msk [vmem:[#allocation8] sm:$0x3] %vm261_vm0, %v253_v33  ;;  %vm238_vm2 = vcmp.ge.u32.totalorder %v230_v28, 429496730  ;;  %vm239_vm3 = vcmp.ge.u32.totalorder %v231_v29, 429496730  ;;  %v115_v5 = vadd.f32 %v295_v62, %v51_v61 }
  0x44   :  { %v254_v39 = vsel %vm238_vm2, %v246_v44, 0.0  ;;  %v255_v40 = vsel %vm239_vm3, %v247_v59, 0.0  ;;  %vm240_vm4 = vcmp.ge.u32.totalorder %v232_v42, 429496730  ;;  %v218_v52 = vmul.u32 2221713035, %v210_v41 }
  0x45   :  { %263 = vst.msk [vmem:[#allocation8 + $0x2] sm:$0x3] %vm261_vm0, %v254_v39  ;;  %264 = vst.msk [vmem:[#allocation8 + $0x4] sm:$0x3] %vm261_vm0, %v255_v40  ;;  %v256_v51 = vsel %vm240_vm4, %v248_v7, 0.0  ;;  %v188_v44 = vxor.u32 %v180_v48, %v172_v38 }
  0x46   :  { %265 = vst.msk [vmem:[#allocation8 + $0x6] sm:$0x3] %vm261_vm0, %v256_v51  ;;  %vm241_vm5 = vcmp.ge.u32.totalorder %v233_v49, 429496730  ;;  %v226_v55 = vshrl.u32 %v218_v52, 16 }
  0x47   :  { %v257_v54 = vsel %vm241_vm5, %v249_v2, 0.0  ;;  %v219_v56 = vmul.u32 2221713035, %v211_v6  ;;  %v196_v57 = vmul.u32 2146121005, %v188_v44 }
  0x48   :  { %266 = vst.msk [vmem:[#allocation8 + $0x8] sm:$0x3] %vm261_vm0, %v257_v54  ;;  %v234_v59 = vxor.u32 %v226_v55, %v218_v52  ;;  %v251_v0 = vmul.f32 1.1111112, %v114_v53  ;;  %v252_v10 = vmul.f32 1.1111112, %v115_v5 }
  0x49   :  { %v227_v60 = vshrl.u32 %v219_v56, 16  ;;  %v204_v63 = vshrl.u32 %v196_v57, 15 }
  0x4a   :  { %vm242_vm6 = vcmp.ge.u32.totalorder %v234_v59, 429496730 }
  0x4b   :  { %v235_v1 = vxor.u32 %v227_v60, %v219_v56  ;;  %v212_v3 = vxor.u32 %v204_v63, %v196_v57  ;;  %v258_v4 = vsel %vm242_vm6, %v250_v58, 0.0 }
  0x4c   :  { %267 = vst.msk [vmem:[#allocation8 + $0xa] sm:$0x3] %vm261_vm0, %v258_v4 }
  0x4d   :  { %vm243_vm7 = vcmp.ge.u32.totalorder %v235_v1, 429496730  ;;  %v220_v7 = vmul.u32 2221713035, %v212_v3 }
  0x4e   :  { %v259_v8 = vsel %vm243_vm7, %v251_v0, 0.0 }
  0x4f   :  { %268 = vst.msk [vmem:[#allocation8 + $0xc] sm:$0x3] %vm261_vm0, %v259_v8  ;;  %v228_v9 = vshrl.u32 %v220_v7, 16 }
  0x51   :  { %v236_v11 = vxor.u32 %v228_v9, %v220_v7 }
  0x53   :  { %vm244_vm8 = vcmp.ge.u32.totalorder %v236_v11, 429496730 }
  0x54   :  { %v260_v12 = vsel %vm244_vm8, %v252_v10, 0.0 }
  0x55   :  { %269 = vst.msk [vmem:[#allocation8 + $0xe] sm:$0x3] %vm261_vm0, %v260_v12 }
  0x56   :  { %358 = shalt.err (!%p355_p6)
}
  0x57   :  { %s359_s19 = scalar_lea.hbm %s478_s3, 256 }
  0x58   :  { %p360_p7 = scmp.ne.s32.totalorder %s478_s3, %s359_s19  ;;  %p363_p8 = scmp.lt.u32.totalorder %s359_s19, %s478_s3 }
  0x5a   :  { %p365_p9 = pnand %p363_p8, %p360_p7 }
  0x5c   :  { %368 = shalt.err (!%p365_p9)
}
  0x5d   :  { %281 = dma.vmem_to_hbm [thread:$0]  %s276_s2, 256, %s478_s3, [#allocation5], %s376_s22, %s376_s22, %s377_s23  }
  0x5e   :  { %373 = dma.done.wait [#allocation5], 256  }
  0x5f   :  { %374 = vsyncadd [#allocation5], 4294967040 }
  0x60   :  { %285 = vsyncpa [#allocation4], 1 }
  0x61   :  { %286 = vsyncpa [#allocation7], 1 }
  0x62   :  { %287 = vsyncpa [#allocation5], 1 }

</bundles_post_ra>
